<compile_context>
chip_gen: v7x
topology: tpu7x:2x2x1
jax: 0.10.0
libtpu: 0.0.40
codegen_flags: <defaults>
</compile_context>

<pallas_src>
import functools

import jax
import jax.numpy as jnp
from jax.experimental import pallas as pl
from jax.experimental.pallas import tpu as pltpu

_LANE = 128  # lane width; pad N_total to this so output stores are lane-dense


def _round_up(x, m):
    return (x + m - 1) // m * m


def _head_kernel(feat_ref, w_ref, b_ref, out_ref):
    # (tm, D) bf16 @ (D, N_pad) bf16 on the MXU with f32 accumulation.
    acc = jnp.dot(feat_ref[...], w_ref[...], preferred_element_type=jnp.float32)
    # Bias add in f32; Identity activation.
    out_ref[...] = (acc + b_ref[...]).astype(out_ref.dtype)


def prepare_head_params(weights, biases, *, compute_dtype=jnp.bfloat16):
    """One-time parameter packing (hoisted out of the forward path).

    weights: list of (n_i, D) Linear weights (PyTorch layout).
    biases:  list of (n_i,) Linear biases.

    Returns (w_pad, b_pad, n_total):
      w_pad: (D, N_pad) in compute_dtype, N_pad = round_up(sum n_i, 128),
             zero-padded columns.
      b_pad: (1, N_pad) float32, zero-padded.
    """
    w_cat = jnp.concatenate([jnp.asarray(w).T for w in weights], axis=1)  # (D, N)
    b_cat = jnp.concatenate([jnp.asarray(b) for b in biases], axis=0)     # (N,)
    n_total = int(w_cat.shape[1])
    n_pad = _round_up(n_total, _LANE)
    w_pad = jnp.pad(w_cat, ((0, 0), (0, n_pad - n_total))).astype(compute_dtype)
    b_pad = jnp.pad(b_cat, (0, n_pad - n_total)).astype(jnp.float32)[None, :]
    return w_pad, b_pad, n_total


@functools.partial(
    jax.jit, static_argnames=("n_total", "block_rows", "use_pallas")
)
def multitask_mvit_head(feat, w_pad, b_pad, *, n_total, block_rows=256,
                        use_pallas=True):
    """Fused multi-task head projection.

    feat:  (B, D) activations.
    w_pad: (D, N_pad) pre-packed weights from prepare_head_params().
    b_pad: (1, N_pad) pre-packed f32 bias.
    Returns (B, n_total) in feat.dtype.
    """
    B, D = feat.shape
    N_pad = w_pad.shape[1]
    out_dtype = feat.dtype

    if not use_pallas:
        # Toy-sized heads: let XLA fuse a plain dot with surrounding ops.
        out = jnp.dot(feat.astype(w_pad.dtype), w_pad,
                      preferred_element_type=jnp.float32) + b_pad
        return out[:, :n_total].astype(out_dtype)

    # Cast activations to the MXU compute dtype (accumulation stays f32).
    feat_c = feat.astype(w_pad.dtype)

    # Batch tiling: tm rows per grid step; W/bias resident in VMEM.
    tm = min(block_rows, _round_up(B, 8))
    b_rows = _round_up(B, tm)
    if b_rows != B:
        feat_c = jnp.pad(feat_c, ((0, b_rows - B), (0, 0)))
    grid = (b_rows // tm,)

    in_item = jnp.dtype(w_pad.dtype).itemsize
    vmem_bytes = (
        D * N_pad * in_item        # resident weights
        + N_pad * 4                # resident bias
        + 2 * tm * D * in_item     # double-buffered feat tiles
        + 2 * tm * N_pad * 4       # double-buffered f32 output tiles
    )
    vmem_limit = min(max(2 * vmem_bytes, 16 * 1024 * 1024), 64 * 1024 * 1024)

    cost = pl.CostEstimate(
        flops=2 * b_rows * D * N_pad,
        transcendentals=0,
        bytes_accessed=(b_rows * D * in_item
                        + D * N_pad * in_item
                        + N_pad * 4
                        + b_rows * N_pad * 4),
    )

    out = pl.pallas_call(
        _head_kernel,
        out_shape=jax.ShapeDtypeStruct((b_rows, N_pad), jnp.float32),
        grid=grid,
        in_specs=[
            pl.BlockSpec((tm, D), lambda i: (i, 0)),       # feat tile per step
            pl.BlockSpec((D, N_pad), lambda i: (0, 0)),    # weights resident
            pl.BlockSpec((1, N_pad), lambda i: (0, 0)),    # bias resident
        ],
        out_specs=pl.BlockSpec((tm, N_pad), lambda i: (i, 0)),
        compiler_params=pltpu.CompilerParams(
            dimension_semantics=("parallel",),             # shard batch tiles across TCs
            vmem_limit_bytes=vmem_limit,
        ),
        cost_estimate=cost,
    )(feat_c, w_pad, b_pad)

    # Drop batch padding and lane padding; restore input dtype.
    return out[:B, :n_total].astype(out_dtype)


if __name__ == "__main__":
    # Small config consistent with the module's constructor:
    dim_in = [32, 32]            # sum(dim_in) = 64 input features
    num_classes = [8, 8, 16]     # three task heads -> N_total = 32 (padded to 128)
    D = sum(dim_in)
    B = 256                      # enough rows to exercise a multi-step batch grid

    key = jax.random.PRNGKey(0)
    k_feat, *k_params = jax.random.split(key, 1 + 2 * len(num_classes))

    feat = jax.random.normal(k_feat, (B, D), dtype=jnp.float32)

    # Deterministic synthetic parameters for each nn.Linear(sum(dim_in), n).
    weights, biases = [], []
    for i, n in enumerate(num_classes):
        kw, kb = k_params[2 * i], k_params[2 * i + 1]
        weights.append(jax.random.normal(kw, (n, D), dtype=jnp.float32) * 0.05)
        biases.append(jax.random.normal(kb, (n,), dtype=jnp.float32) * 0.05)

    # One-time parameter packing (init-time, not per-forward).
    w_pad, b_pad, n_total = prepare_head_params(weights, biases)

    # Run the Pallas kernel path (block_rows=128 -> grid of 2 batch tiles).
    out = multitask_mvit_head(feat, w_pad, b_pad, n_total=n_total,
                              block_rows=128, use_pallas=True)
    out = jax.block_until_ready(out)

    # Reference: per-task Linear + Identity act, then concat along dim 1 (f32).
    ref = jnp.concatenate(
        [feat @ w.T + b[None, :] for w, b in zip(weights, biases)], axis=1
    )
    assert out.shape == (B, sum(num_classes))
    # bf16 MXU inputs with f32 accumulation -> loosened tolerance vs f32 ref.
    assert jnp.allclose(out, ref, atol=3e-2, rtol=3e-2), (
        float(jnp.max(jnp.abs(out - ref)))
    )

    print("KERNEL_OK")
</pallas_src>

<mosaic_0001>
module attributes {stable_mosaic.version = 11 : i64} {
  func.func @_head_kernel(%arg0: i32, %arg1: memref<128x64xbf16, #tpu.memory_space<vmem>>, %arg2: memref<64x128xbf16, #tpu.memory_space<vmem>>, %arg3: memref<1x128xf32, #tpu.memory_space<vmem>>, %arg4: memref<128x128xf32, #tpu.memory_space<vmem>>) attributes {dimension_semantics = [#tpu.dimension_semantics<parallel>], iteration_bounds = array<i64: 2>, scalar_prefetch = 0 : i64, scratch_operands = 0 : i64, tpu.core_type = #tpu.core_type<tc>, window_params = [{transform_indices = @transform_0, window_bounds = array<i64: 128, 64>}, {pipeline_mode = #tpu.pipeline_mode<synchronous>, transform_indices = @transform_1, window_bounds = array<i64: 64, 128>}, {pipeline_mode = #tpu.pipeline_mode<synchronous>, transform_indices = @transform_2, window_bounds = array<i64: 1, 128>}, {transform_indices = @transform_3, window_bounds = array<i64: 128, 128>}]} {
    %c0 = arith.constant 0 : index
    %c0_0 = arith.constant 0 : index
    %0 = vector.load %arg1[%c0, %c0_0] : memref<128x64xbf16, #tpu.memory_space<vmem>>, vector<128x64xbf16>
    %c0_1 = arith.constant 0 : index
    %c0_2 = arith.constant 0 : index
    %1 = vector.load %arg2[%c0_1, %c0_2] : memref<64x128xbf16, #tpu.memory_space<vmem>>, vector<64x128xbf16>
    %cst = arith.constant dense<0.000000e+00> : vector<128x128xf32>
    %2 = tpu.matmul %0, %1, %cst {dimension_numbers = #tpu.dot_dimension_numbers<[1], [0], [0], [1], [0, 0, 1, 1], [], []>} : vector<128x64xbf16>, vector<64x128xbf16>, vector<128x128xf32> -> vector<128x128xf32>
    %c0_3 = arith.constant 0 : index
    %c0_4 = arith.constant 0 : index
    %3 = vector.load %arg3[%c0_3, %c0_4] : memref<1x128xf32, #tpu.memory_space<vmem>>, vector<1x128xf32>
    %4 = vector.broadcast %3 : vector<1x128xf32> to vector<128x128xf32>
    %5 = arith.addf %2, %4 : vector<128x128xf32>
    %c0_5 = arith.constant 0 : index
    %c0_6 = arith.constant 0 : index
    %6 = vector.load %arg4[%c0_5, %c0_6] : memref<128x128xf32, #tpu.memory_space<vmem>>, vector<128x128xf32>
    tpu.vector_store %arg4[%c0_5, %c0_6], %5 {strides = array<i32>} : memref<128x128xf32, #tpu.memory_space<vmem>>, vector<128x128xf32>,
    return
  }
  func.func @transform_0(%arg0: i32) -> (i32, i32) {
    %c0_i32 = arith.constant 0 : i32
    %c0_i32_0 = arith.constant 0 : i32
    return %arg0, %c0_i32 : i32, i32
  }
  func.func @transform_1(%arg0: i32) -> (i32, i32) {
    %c0_i32 = arith.constant 0 : i32
    %c0_i32_0 = arith.constant 0 : i32
    %c0_i32_1 = arith.constant 0 : i32
    return %c0_i32, %c0_i32_0 : i32, i32
  }
  func.func @transform_2(%arg0: i32) -> (i32, i32) {
    %c0_i32 = arith.constant 0 : i32
    %c0_i32_0 = arith.constant 0 : i32
    %c0_i32_1 = arith.constant 0 : i32
    return %c0_i32, %c0_i32_0 : i32, i32
  }
  func.func @transform_3(%arg0: i32) -> (i32, i32) {
    %c0_i32 = arith.constant 0 : i32
    %c0_i32_0 = arith.constant 0 : i32
    return %arg0, %c0_i32 : i32, i32
  }
}

</mosaic_0001>

<bundles_post_ra>
// kernel: multitask_mvit_head.1
= control target key start
LH: loop header
LB: loop body
LE: loop exit
PB: predicated region body
PF: predicated region fallthrough
CT: control target
= control target key end

     0   :  { %s588_s12 = smov 0   ;;  %s650_s0 = inlined_call_operand.vmem [shape: bf16[256,64], index: 0, kind: input, shape index: {}]   ;;  %s651_s1 = inlined_call_operand.vmem [shape: bf16[64,128], index: 1, kind: input, shape index: {}]   ;;  %s652_s2 = inlined_call_operand.vmem [shape: f32[1,128], index: 2, kind: input, shape index: {}]   ;;  %s653_s3 = inlined_call_operand.vmem [shape: f32[256,128], index: 3, kind: output, shape index: {}]  }
   0x1 LB: > { %s464_s13 = sadd.s32 4294967295, %s566_s12   ;;  %p468_p0 = scmp.ge.s32.totalorder %s566_s12, 1  ;;  %s566_s12 = sphi %s588_s12, %s13_s12  }
   0x2   : > { %p138_p1 = scmp.lt.s32.totalorder %s566_s12, 3 }
   0x4   : > { %p139_p2 = pnand %p468_p0, %p138_p1 }
   0x5   : > { %v548_v0 = vld [vmem:[%s651_s1] sm:$0xff] (!%p139_p2)   ;;  %s469_s16 = sshll.u32 (!%p139_p2), %s464_s13, 4  ;;  %v549_v1 = vld [vmem:[%s651_s1 + $0x8] sm:$0xff] (!%p139_p2)   ;;  %v550_v2 = vld [vmem:[%s651_s1 + $0x10] sm:$0xff] (!%p139_p2)   ;;  %vm270_vm0 = vcmask (!%p139_p2), 523264  }
   0x6   : > { %142 = sbr.rel (%p139_p2) target bundleno = 248 (0xf8), region = 32  ;;  %p163_p3 = scmp.lt.s32.totalorder (!%p139_p2), %s469_s16, 31  ;;  %508 = vmatprep.subr.bf16.mxu0 (!%p139_p2), %v548_v0  ;;  %532 = vmatprep.subr.bf16.mxu1 (!%p139_p2), %v548_v0  ;;  %v551_v3 = vld [vmem:[%s651_s1 + $0x18] sm:$0xff] (!%p139_p2)   ;;  %v473_v12 = vld [vmem:[%s652_s2] ss:$0 sm:$0xff] (!%p139_p2) }
   0x7   : > { %509 = vmatpush3.bf16.msra.mxu0 (!%p139_p2), %v548_v0  ;;  %536 = vmatpush3.bf16.msra.mxu1 (!%p139_p2), %v548_v0 }
   0x8   : > { %510 = vmatprep.subr.bf16.mxu0 (!%p139_p2), %v549_v1  ;;  %533 = vmatprep.subr.bf16.mxu1 (!%p139_p2), %v549_v1 }
   0xb   : > { %511 = vmatpush3.bf16.msra.mxu0 (!%p139_p2), %v549_v1  ;;  %537 = vmatpush3.bf16.msra.mxu1 (!%p139_p2), %v549_v1 }
   0xc   : > { %512 = vmatprep.subr.bf16.mxu0 (!%p139_p2), %v550_v2  ;;  %534 = vmatprep.subr.bf16.mxu1 (!%p139_p2), %v550_v2 }
   0xd   : > { %s655_s16 = smov (!%p163_p3, %s469_s16), 31 }
   0xe   : > { %s470_s21 = sshll.u32 %s655_s16, 2  ;;  %s472_s27 = sshll.u32 %s655_s16, 3 }
   0xf   : > { %s166_s26 = scalar_lea.vmem %s650_s0, %s470_s21  ;;  %513 = vmatpush3.bf16.msra.mxu0 %v550_v2  ;;  %538 = vmatpush3.bf16.msra.mxu1 %v550_v2  ;;  %s629_s5 = scalar_lea.vmem %s653_s3, %s472_s27 }
  0x10   : > { %v552_v4 = vld [vmem:[%s166_s26] sm:$0xff]   ;;  %514 = vmatprep.subr.bf16.mxu0 %v551_v3  ;;  %535 = vmatprep.subr.bf16.mxu1 %v551_v3  ;;  %v554_v6 = vld [vmem:[%s166_s26 + $0x8] sm:$0xff]   ;;  %v556_v8 = vld [vmem:[%s166_s26 + $0x10] sm:$0xff]  }
  0x11   : > { %v553_v5 = vld [vmem:[%s166_s26 + $0x20] sm:$0xff]   ;;  %516 = vmatprep.mubr.msk.bf16.mxu0 %vm270_vm0, %v552_v4  ;;  %v555_v7 = vld [vmem:[%s166_s26 + $0x28] sm:$0xff]   ;;  %v557_v9 = vld [vmem:[%s166_s26 + $0x30] sm:$0xff]  }
  0x12   : > { %524 = vmatprep.mubr.msk.bf16.mxu1 %vm270_vm0, %v553_v5  ;;  %v558_v10 = vld [vmem:[%s166_s26 + $0x18] sm:$0xff]  }
  0x13   : > { %515 = vmatpush3.bf16.msra.mxu0 %v551_v3  ;;  %539 = vmatpush3.bf16.msra.mxu1 %v551_v3  ;;  %v559_v11 = vld [vmem:[%s166_s26 + $0x38] sm:$0xff]  }
  0x16   : > { %517 = vmatmul.mubr.msk.bf16.vlgmr.msra.gmra.mrb[0].mxu0 %vm270_vm0, %v554_v6  ;;  %525 = vmatmul.mubr.msk.bf16.vlgmr.msra.gmra.mrb[0].mxu1 %vm270_vm0, %v555_v7 }
  0x17   : > { %520 = vmatprep.mubr.msk.bf16.mxu0 %vm270_vm0, %v556_v8  ;;  %528 = vmatprep.mubr.msk.bf16.mxu1 %vm270_vm0, %v557_v9 }
  0x1e   : > { %521 = vmatmul.mubr.msk.bf16.gmra.mrb[4].mxu0 %vm270_vm0, %v558_v10  ;;  %529 = vmatmul.mubr.msk.bf16.gmra.mrb[4].mxu1 %vm270_vm0, %v559_v11 }
  0xe9   : > { %v518_v13 = vpop.f32.mrb[0].mxu0  ;;  %v526_v14 = vpop.f32.mrb[0].mxu1 }
  0xea   : > { %v338_v15 = vadd.f32 %v518_v13, %v473_v12  ;;  %v370_v16 = vadd.f32 %v526_v14, %v473_v12  ;;  %v329_v17 = vpop.f32.mrb[1].mxu0  ;;  %v361_v18 = vpop.f32.mrb[1].mxu1 }
  0xeb   : > { %v330_v19 = vadd.f32 %v473_v12, %v329_v17  ;;  %v362_v20 = vadd.f32 %v473_v12, %v361_v18  ;;  %v519_v21 = vpop.f32.mrb[2].mxu0  ;;  %v527_v22 = vpop.f32.mrb[2].mxu1 }
  0xec   : > { %394 = vst [vmem:[%s629_s5 + $0x10] sm:$0xff] %v338_v15  ;;  %402 = vst [vmem:[%s629_s5 + $0x50] sm:$0xff] %v370_v16  ;;  %v341_v23 = vadd.f32 %v519_v21, %v473_v12  ;;  %v373_v24 = vadd.f32 %v527_v22, %v473_v12  ;;  %v332_v25 = vpop.f32.mrb[3].mxu0  ;;  %v364_v26 = vpop.f32.mrb[3].mxu1 }
  0xed   : > { %392 = vst [vmem:[%s629_s5] sm:$0xff] %v330_v19  ;;  %400 = vst [vmem:[%s629_s5 + $0x40] sm:$0xff] %v362_v20  ;;  %v333_v27 = vadd.f32 %v473_v12, %v332_v25  ;;  %v365_v28 = vadd.f32 %v473_v12, %v364_v26 }
  0xee   : > { %395 = vst [vmem:[%s629_s5 + $0x18] sm:$0xff] %v341_v23  ;;  %403 = vst [vmem:[%s629_s5 + $0x58] sm:$0xff] %v373_v24 }
  0xef   : > { %393 = vst [vmem:[%s629_s5 + $0x8] sm:$0xff] %v333_v27  ;;  %401 = vst [vmem:[%s629_s5 + $0x48] sm:$0xff] %v365_v28 }
  0xf1   : > { %v522_v29 = vpop.f32.mrb[4].mxu0  ;;  %v530_v30 = vpop.f32.mrb[4].mxu1 }
  0xf2   : > { %v354_v31 = vadd.f32 %v522_v29, %v473_v12  ;;  %v386_v32 = vadd.f32 %v530_v30, %v473_v12  ;;  %v345_v33 = vpop.f32.mrb[5].mxu0  ;;  %v377_v34 = vpop.f32.mrb[5].mxu1 }
  0xf3   : > { %v346_v35 = vadd.f32 %v473_v12, %v345_v33  ;;  %v378_v36 = vadd.f32 %v473_v12, %v377_v34  ;;  %v523_v37 = vpop.f32.mrb[6].mxu0  ;;  %v531_v38 = vpop.f32.mrb[6].mxu1 }
  0xf4   : > { %398 = vst [vmem:[%s629_s5 + $0x30] sm:$0xff] %v354_v31  ;;  %406 = vst [vmem:[%s629_s5 + $0x70] sm:$0xff] %v386_v32  ;;  %v357_v39 = vadd.f32 %v523_v37, %v473_v12  ;;  %v389_v40 = vadd.f32 %v531_v38, %v473_v12  ;;  %v348_v41 = vpop.f32.mrb[7].mxu0  ;;  %v380_v42 = vpop.f32.mrb[7].mxu1 }
  0xf5   : > { %396 = vst [vmem:[%s629_s5 + $0x20] sm:$0xff] %v346_v35  ;;  %404 = vst [vmem:[%s629_s5 + $0x60] sm:$0xff] %v378_v36  ;;  %v349_v43 = vadd.f32 %v473_v12, %v348_v41  ;;  %v381_v44 = vadd.f32 %v473_v12, %v380_v42 }
  0xf6   : > { %399 = vst [vmem:[%s629_s5 + $0x38] sm:$0xff] %v357_v39  ;;  %407 = vst [vmem:[%s629_s5 + $0x78] sm:$0xff] %v389_v40 }
  0xf7   : > { %397 = vst [vmem:[%s629_s5 + $0x28] sm:$0xff] %v349_v43  ;;  %405 = vst [vmem:[%s629_s5 + $0x68] sm:$0xff] %v381_v44 }
  0xf8 PF: > { %s13_s12 = sadd.s32 1, %s566_s12  }
  0xf9   : > { %p10_p4 = scmp.ge.s32.totalorder %s13_s12, 4  }
  0xfb   :  { %12 = sbr.rel (!%p10_p4) target bundleno = 1 (0x1), region = 62 }

</bundles_post_ra>
